<compile_context>
chip_gen: v6e
topology: v6e:2x2x1
jax: 0.10.0
libtpu: 0.0.40
codegen_flags: <defaults>
</compile_context>

<pallas_src>
import jax
import jax.numpy as jnp
from jax.experimental import pallas as pl
from jax.experimental.pallas import tpu as pltpu

TAU = 0.1        # gumbel-softmax temperature (argmax-invariant -> dropped in fwd)
THRESH = 0.8     # sharp_sigmoid threshold   (folded into encoder bias)
SHARP = 20.0     # sharp_sigmoid sharpness   (folded into encoder weights)


def sae_kernel(x_ref, noise_ref, wstack_ref, rows_ref, wmlp_ref, bmlp_ref,
               out_ref, p_ref, logits_ref):
    x = x_ref[...]                                     # (TB, N)
    rows = rows_ref[...]                               # (4, N)
    wenc0 = rows[0:1, :]                               # raw W_enc[:, 0]   (1, N)
    benc0 = rows[1:2, :]                               # raw b_enc[:, 0]   (1, N)
    wdec0 = rows[2:3, :]                               # W_dec[0, :]       (1, N)
    bdec = rows[3:4, :]                                # decoder bias      (1, N)

    # --- Hard Gumbel-softmax (forward value) over the spatial axis, channel 0.
    # argmax((z + g)/tau) == argmax(z + g) for tau > 0, so /tau is dropped.
    g = x * wenc0 + benc0 + noise_ref[...]             # (TB, N)
    gmax = jnp.max(g, axis=-1, keepdims=True)
    col = jax.lax.broadcasted_iota(jnp.int32, g.shape, 1)
    first_arg = jnp.min(jnp.where(g >= gmax, col, jnp.int32(2 ** 30)),
                        axis=-1, keepdims=True)        # first argmax (torch tie rule)
    onehot = (col == first_arg).astype(x.dtype)        # (TB, N)

    # --- sharp_sigmoid for channels 1..L-1 (SHARP/THRESH pre-folded in wrapper).
    wenc_s = wstack_ref[0]                             # (L, N) = SHARP * W_enc^T
    benc_s = wstack_ref[1]                             # (L, N) = SHARP*(b_enc^T - THRESH)
    wdec_z = wstack_ref[2]                             # (L, N) = W_dec, row 0 zeroed
    sig = jax.nn.sigmoid(x[:, None, :] * wenc_s[None] + benc_s[None])   # (TB, L, N)

    # Latent block P: channel 0 <- one-hot, channels 1.. <- sharp sigmoid.
    # Tiny (L, N) channel mask + one select; no full-size iota/compare temps.
    L, N = wenc_s.shape
    ch = jax.lax.broadcasted_iota(jnp.int32, (L, N), 0)
    p_ref[...] = jnp.where((ch > 0)[None], sig, onehot[:, None, :])

    # --- Decoder: out[b,i] = sum_l P[b,l,i]*W_dec[l,i] + b_dec[i].
    # Channel 0 contributes via the one-hot (W_dec row 0 zeroed in wdec_z).
    out_ref[...] = (jnp.sum(sig * wdec_z[None], axis=1)
                    + onehot * wdec0 + bdec)           # (TB, N)

    # --- Classifier head on the gumbel-masked input: one dense MXU matmul.
    logits_ref[...] = (jnp.dot(onehot * x, wmlp_ref[...],
                               preferred_element_type=jnp.float32)
                       + bmlp_ref[...])                # (TB, CPAD)


def sparse_autoencoder_conv(x, gumbel_noise, params, latent_channels, num_classes):
    B, C_in, H, W = x.shape
    N = H * W
    L = latent_channels
    CPAD = max(128, pl.cdiv(num_classes, 128) * 128)   # class dim padded to lanes
    f32 = jnp.float32

    # ---- batch tiling: TB multiple of 8, capped at 128; >= 2 grid steps for
    # B > 8 so v7x's second TensorCore gets work ("parallel" batch axis).
    if B <= 8:
        TB = 8
    else:
        TB = max(8, min(128, ((pl.cdiv(B, 2) + 7) // 8) * 8))
    B_pad = pl.cdiv(B, TB) * TB
    n_steps = B_pad // TB

    # ---- weight prep (one-time, wrapper side) ----
    wenc_t = params["pixel_weights_encoder"].T.astype(f32)    # (L, N)
    benc_t = params["bias_encoder"].T.astype(f32)             # (L, N)
    wdec = params["pixel_weights"].astype(f32)                # (L, N)
    bdec = params["bias"].astype(f32)                         # (N,)

    wenc_sig = SHARP * wenc_t                                 # fold sharp_sigmoid
    benc_sig = SHARP * (benc_t - THRESH)
    wdec_z0 = wdec.at[0, :].set(0.0)                          # channel 0 via one-hot

    wstack = jnp.stack([wenc_sig, benc_sig, wdec_z0], axis=0)         # (3, L, N)
    rows = jnp.stack([wenc_t[0], benc_t[0], wdec[0], bdec], axis=0)   # (4, N)

    wmlp_t = jnp.zeros((N, CPAD), f32).at[:, :num_classes].set(
        params["mlp_w"].T.astype(f32))                                # (N, CPAD)
    bmlp_p = jnp.zeros((1, CPAD), f32).at[0, :num_classes].set(
        params["mlp_b"].astype(f32))                                  # (1, CPAD)

    x_flat = x.reshape(B, N).astype(f32)
    noise = gumbel_noise.astype(f32)
    if B_pad != B:
        pad = ((0, B_pad - B), (0, 0))
        x_flat = jnp.pad(x_flat, pad)
        noise = jnp.pad(noise, pad)

    out_flat, P_flat, logits_pad = pl.pallas_call(
        sae_kernel,
        out_shape=(
            jax.ShapeDtypeStruct((B_pad, N), f32),
            jax.ShapeDtypeStruct((B_pad, L, N), f32),
            jax.ShapeDtypeStruct((B_pad, CPAD), f32),
        ),
        grid_spec=pltpu.PrefetchScalarGridSpec(
            num_scalar_prefetch=0,
            grid=(n_steps,),
            in_specs=[
                pl.BlockSpec((TB, N), lambda b: (b, 0)),        # x_flat
                pl.BlockSpec((TB, N), lambda b: (b, 0)),        # gumbel noise
                pl.BlockSpec((3, L, N), lambda b: (0, 0, 0)),   # stacked L x N weights
                pl.BlockSpec((4, N), lambda b: (0, 0)),         # stacked row vectors
                pl.BlockSpec((N, CPAD), lambda b: (0, 0)),      # W_mlp^T (padded)
                pl.BlockSpec((1, CPAD), lambda b: (0, 0)),      # b_mlp   (padded)
            ],
            out_specs=[
                pl.BlockSpec((TB, N), lambda b: (b, 0)),
                pl.BlockSpec((TB, L, N), lambda b: (b, 0, 0)),
                pl.BlockSpec((TB, CPAD), lambda b: (b, 0)),
            ],
        ),
        compiler_params=pltpu.CompilerParams(
            dimension_semantics=("parallel",)),
    )(x_flat, noise, wstack, rows, wmlp_t, bmlp_p)

    output = out_flat[:B].reshape(B, C_in, H, W)
    P = P_flat[:B].reshape(B, L, H, W)
    logits = logits_pad[:B, :num_classes]
    return output, P, logits


def reference_forward(x, gumbel_noise, params, latent_channels, num_classes):
    """Pure-JAX mirror of the PyTorch forward, for verification."""
    B, _, H, W = x.shape
    N = H * W
    L = latent_channels
    x_flat = x.reshape(B, N)
    P = (x_flat[:, :, None] * params["pixel_weights_encoder"][None]
         + params["bias_encoder"][None])                              # (B, N, L)
    g = (P[:, :, 0] + gumbel_noise) / TAU
    onehot = jax.nn.one_hot(jnp.argmax(g, axis=-1), N, dtype=x.dtype)
    P = P.at[:, :, 0].set(onehot)
    Pt = jnp.transpose(P, (0, 2, 1)).reshape(B, L, H, W)
    Pt = Pt.at[:, 1:].set(jax.nn.sigmoid(SHARP * (Pt[:, 1:] - THRESH)))
    logits = ((Pt[:, 0] * x[:, 0]).reshape(B, N) @ params["mlp_w"].T
              + params["mlp_b"])
    P_flat = Pt.reshape(B, L, N)
    out = jnp.einsum("bci,ci->bi", P_flat, params["pixel_weights"]) + params["bias"]
    return out.reshape(B, 1, H, W), Pt, logits


if __name__ == "__main__":
    # Small shapes consistent with the module: input_size=(1, H, W)
    B, H, W = 8, 8, 16
    N = H * W                      # 128
    L = 32                         # latent_channels
    NUM_CLASSES = 5

    key = jax.random.PRNGKey(0)
    k_x, k_we, k_wd, k_mw, k_mb, k_g = jax.random.split(key, 6)

    params = {
        "pixel_weights_encoder": jax.random.normal(k_we, (N, L), jnp.float32),
        "bias_encoder": jnp.zeros((N, L), jnp.float32),
        "pixel_weights": jax.random.normal(k_wd, (L, N), jnp.float32),
        "bias": jnp.zeros((N,), jnp.float32),
        "mlp_w": jax.random.normal(k_mw, (NUM_CLASSES, N), jnp.float32)
                 * (1.0 / jnp.sqrt(N)),
        "mlp_b": jax.random.normal(k_mb, (NUM_CLASSES,), jnp.float32) * 0.01,
    }

    x = jax.random.normal(k_x, (B, 1, H, W), jnp.float32)
    # The torch forward draws gumbel noise inside F.gumbel_softmax; we draw it
    # deterministically here and feed it to the kernel.
    # TODO(synk): in-op gumbel sampling (torch draws it inside the forward).
    gumbel_noise = jax.random.gumbel(k_g, (B, N), jnp.float32)

    out, P, logits = sparse_autoencoder_conv(x, gumbel_noise, params, L, NUM_CLASSES)
    jax.block_until_ready((out, P, logits))

    out_r, P_r, logits_r = reference_forward(x, gumbel_noise, params, L, NUM_CLASSES)
    assert out.shape == (B, 1, H, W) and P.shape == (B, L, H, W) \
        and logits.shape == (B, NUM_CLASSES)
    # Slightly looser tolerances than bit-exact: SHARP/THRESH are folded into
    # the weights in the kernel, so float reassociation differs from the ref.
    assert bool(jnp.allclose(out, out_r, atol=1e-3, rtol=1e-4))
    assert bool(jnp.allclose(P, P_r, atol=1e-4, rtol=1e-4))
    assert bool(jnp.allclose(logits, logits_r, atol=1e-4, rtol=1e-4))

    print("KERNEL_OK")
</pallas_src>

<mosaic_0001>
module attributes {stable_mosaic.version = 11 : i64} {
  func.func @sae_kernel(%arg0: i32, %arg1: memref<8x128xf32, #tpu.memory_space<vmem>>, %arg2: memref<8x128xf32, #tpu.memory_space<vmem>>, %arg3: memref<3x32x128xf32, #tpu.memory_space<vmem>>, %arg4: memref<4x128xf32, #tpu.memory_space<vmem>>, %arg5: memref<128x128xf32, #tpu.memory_space<vmem>>, %arg6: memref<1x128xf32, #tpu.memory_space<vmem>>, %arg7: memref<8x128xf32, #tpu.memory_space<vmem>>, %arg8: memref<8x32x128xf32, #tpu.memory_space<vmem>>, %arg9: memref<8x128xf32, #tpu.memory_space<vmem>>) attributes {dimension_semantics = [#tpu.dimension_semantics<parallel>], iteration_bounds = array<i64: 1>, scalar_prefetch = 0 : i64, scratch_operands = 0 : i64, tpu.core_type = #tpu.core_type<tc>, window_params = [{transform_indices = @transform_0, window_bounds = array<i64: 8, 128>}, {transform_indices = @transform_1, window_bounds = array<i64: 8, 128>}, {pipeline_mode = #tpu.pipeline_mode<synchronous>, transform_indices = @transform_2, window_bounds = array<i64: 3, 32, 128>}, {pipeline_mode = #tpu.pipeline_mode<synchronous>, transform_indices = @transform_3, window_bounds = array<i64: 4, 128>}, {pipeline_mode = #tpu.pipeline_mode<synchronous>, transform_indices = @transform_4, window_bounds = array<i64: 128, 128>}, {pipeline_mode = #tpu.pipeline_mode<synchronous>, transform_indices = @transform_5, window_bounds = array<i64: 1, 128>}, {transform_indices = @transform_6, window_bounds = array<i64: 8, 128>}, {transform_indices = @transform_7, window_bounds = array<i64: 8, 32, 128>}, {transform_indices = @transform_8, window_bounds = array<i64: 8, 128>}]} {
    %c0 = arith.constant 0 : index
    %c0_0 = arith.constant 0 : index
    %0 = vector.load %arg1[%c0, %c0_0] : memref<8x128xf32, #tpu.memory_space<vmem>>, vector<8x128xf32>
    %c0_1 = arith.constant 0 : index
    %c0_2 = arith.constant 0 : index
    %1 = vector.load %arg4[%c0_1, %c0_2] : memref<4x128xf32, #tpu.memory_space<vmem>>, vector<4x128xf32>
    %2 = vector.extract_strided_slice %1 {offsets = [0, 0], sizes = [1, 128], strides = [1, 1]} : vector<4x128xf32> to vector<1x128xf32>
    %3 = vector.extract_strided_slice %1 {offsets = [1, 0], sizes = [1, 128], strides = [1, 1]} : vector<4x128xf32> to vector<1x128xf32>
    %4 = vector.extract_strided_slice %1 {offsets = [2, 0], sizes = [1, 128], strides = [1, 1]} : vector<4x128xf32> to vector<1x128xf32>
    %5 = vector.extract_strided_slice %1 {offsets = [3, 0], sizes = [1, 128], strides = [1, 1]} : vector<4x128xf32> to vector<1x128xf32>
    %6 = vector.broadcast %2 : vector<1x128xf32> to vector<8x128xf32>
    %7 = arith.mulf %0, %6 : vector<8x128xf32>
    %8 = vector.broadcast %3 : vector<1x128xf32> to vector<8x128xf32>
    %9 = arith.addf %7, %8 : vector<8x128xf32>
    %c0_3 = arith.constant 0 : index
    %c0_4 = arith.constant 0 : index
    %10 = vector.load %arg2[%c0_3, %c0_4] : memref<8x128xf32, #tpu.memory_space<vmem>>, vector<8x128xf32>
    %11 = arith.addf %9, %10 : vector<8x128xf32>
    %cst = arith.constant dense<0xFF800000> : vector<8xf32>
    %12 = vector.multi_reduction <maximumf>, %11, %cst [1] : vector<8x128xf32> to vector<8xf32>
    %13 = vector.shape_cast %12 : vector<8xf32> to vector<8x1xf32>
    %14 = tpu.iota {dimensions = array<i32: 1>} : vector<8x128xi32>
    %15 = vector.broadcast %13 : vector<8x1xf32> to vector<8x128xf32>
    %16 = arith.cmpf oge, %11, %15 : vector<8x128xf32>
    %c1073741824_i32 = arith.constant 1073741824 : i32
    %17 = vector.broadcast %c1073741824_i32 : i32 to vector<8x128xi32>
    %18 = arith.select %16, %14, %17 : vector<8x128xi1>, vector<8x128xi32>
    %cst_5 = arith.constant dense<2147483647> : vector<8xi32>
    %19 = vector.multi_reduction <minsi>, %18, %cst_5 [1] : vector<8x128xi32> to vector<8xi32>
    %20 = vector.shape_cast %19 : vector<8xi32> to vector<8x1xi32>
    %21 = vector.broadcast %20 : vector<8x1xi32> to vector<8x128xi32>
    %22 = arith.cmpi eq, %14, %21 : vector<8x128xi32>
    %23 = arith.extui %22 : vector<8x128xi1> to vector<8x128xi32>
    %24 = arith.sitofp %23 : vector<8x128xi32> to vector<8x128xf32>
    %c0_6 = arith.constant 0 : index
    %c0_7 = arith.constant 0 : index
    %c0_8 = arith.constant 0 : index
    %25 = vector.load %arg3[%c0_6, %c0_7, %c0_8] : memref<3x32x128xf32, #tpu.memory_space<vmem>>, vector<1x32x128xf32>
    %26 = vector.shape_cast %25 : vector<1x32x128xf32> to vector<32x128xf32>
    %c1 = arith.constant 1 : index
    %c0_9 = arith.constant 0 : index
    %c0_10 = arith.constant 0 : index
    %27 = vector.load %arg3[%c1, %c0_9, %c0_10] : memref<3x32x128xf32, #tpu.memory_space<vmem>>, vector<1x32x128xf32>
    %28 = vector.shape_cast %27 : vector<1x32x128xf32> to vector<32x128xf32>
    %c2 = arith.constant 2 : index
    %c0_11 = arith.constant 0 : index
    %c0_12 = arith.constant 0 : index
    %29 = vector.load %arg3[%c2, %c0_11, %c0_12] : memref<3x32x128xf32, #tpu.memory_space<vmem>>, vector<1x32x128xf32>
    %30 = vector.shape_cast %29 : vector<1x32x128xf32> to vector<32x128xf32>
    %31 = vector.shape_cast %0 : vector<8x128xf32> to vector<8x1x128xf32>
    %32 = vector.shape_cast %26 : vector<32x128xf32> to vector<1x32x128xf32>
    %33 = vector.broadcast %31 : vector<8x1x128xf32> to vector<8x32x128xf32>
    %34 = vector.broadcast %32 : vector<1x32x128xf32> to vector<8x32x128xf32>
    %35 = arith.mulf %33, %34 : vector<8x32x128xf32>
    %36 = vector.shape_cast %28 : vector<32x128xf32> to vector<1x32x128xf32>
    %37 = vector.broadcast %36 : vector<1x32x128xf32> to vector<8x32x128xf32>
    %38 = arith.addf %35, %37 : vector<8x32x128xf32>
    %39 = arith.negf %38 : vector<8x32x128xf32>
    %40 = math.exp %39 : vector<8x32x128xf32>
    %cst_13 = arith.constant 1.000000e+00 : f32
    %41 = vector.broadcast %cst_13 : f32 to vector<8x32x128xf32>
    %42 = arith.addf %41, %40 : vector<8x32x128xf32>
    %43 = arith.divf %41, %42 : vector<8x32x128xf32>
    %44 = tpu.iota {dimensions = array<i32: 0>} : vector<32x128xi32>
    %c0_i32 = arith.constant 0 : i32
    %45 = vector.broadcast %c0_i32 : i32 to vector<32x128xi32>
    %46 = arith.cmpi sgt, %44, %45 : vector<32x128xi32>
    %47 = vector.shape_cast %46 : vector<32x128xi1> to vector<1x32x128xi1>
    %48 = vector.shape_cast %24 : vector<8x128xf32> to vector<8x1x128xf32>
    %49 = vector.shape_cast %47 : vector<1x32x128xi1> to vector<1x32x128xi1>
    %50 = vector.broadcast %49 : vector<1x32x128xi1> to vector<8x32x128xi1>
    %51 = vector.shape_cast %48 : vector<8x1x128xf32> to vector<8x1x128xf32>
    %52 = vector.broadcast %51 : vector<8x1x128xf32> to vector<8x32x128xf32>
    %53 = arith.select %50, %43, %52 : vector<8x32x128xi1>, vector<8x32x128xf32>
    %c0_14 = arith.constant 0 : index
    %c0_15 = arith.constant 0 : index
    %c0_16 = arith.constant 0 : index
    %54 = vector.load %arg8[%c0_14, %c0_15, %c0_16] : memref<8x32x128xf32, #tpu.memory_space<vmem>>, vector<8x32x128xf32>
    tpu.vector_store %arg8[%c0_14, %c0_15, %c0_16], %53 {strides = array<i32>} : memref<8x32x128xf32, #tpu.memory_space<vmem>>, vector<8x32x128xf32>,
    %55 = vector.shape_cast %30 : vector<32x128xf32> to vector<1x32x128xf32>
    %56 = vector.broadcast %55 : vector<1x32x128xf32> to vector<8x32x128xf32>
    %57 = arith.mulf %43, %56 : vector<8x32x128xf32>
    %cst_17 = arith.constant dense<0.000000e+00> : vector<8x128xf32>
    %58 = vector.multi_reduction <add>, %57, %cst_17 [1] : vector<8x32x128xf32> to vector<8x128xf32>
    %59 = vector.broadcast %4 : vector<1x128xf32> to vector<8x128xf32>
    %60 = arith.mulf %24, %59 : vector<8x128xf32>
    %61 = arith.addf %58, %60 : vector<8x128xf32>
    %62 = vector.broadcast %5 : vector<1x128xf32> to vector<8x128xf32>
    %63 = arith.addf %61, %62 : vector<8x128xf32>
    %c0_18 = arith.constant 0 : index
    %c0_19 = arith.constant 0 : index
    %64 = vector.load %arg7[%c0_18, %c0_19] : memref<8x128xf32, #tpu.memory_space<vmem>>, vector<8x128xf32>
    tpu.vector_store %arg7[%c0_18, %c0_19], %63 {strides = array<i32>} : memref<8x128xf32, #tpu.memory_space<vmem>>, vector<8x128xf32>,
    %65 = arith.mulf %24, %0 : vector<8x128xf32>
    %c0_20 = arith.constant 0 : index
    %c0_21 = arith.constant 0 : index
    %66 = vector.load %arg5[%c0_20, %c0_21] : memref<128x128xf32, #tpu.memory_space<vmem>>, vector<128x128xf32>
    %cst_22 = arith.constant dense<0.000000e+00> : vector<8x128xf32>
    %67 = tpu.matmul %65, %66, %cst_22 {dimension_numbers = #tpu.dot_dimension_numbers<[1], [0], [0], [1], [0, 0, 1, 1], [], []>} : vector<8x128xf32>, vector<128x128xf32>, vector<8x128xf32> -> vector<8x128xf32>
    %c0_23 = arith.constant 0 : index
    %c0_24 = arith.constant 0 : index
    %68 = vector.load %arg6[%c0_23, %c0_24] : memref<1x128xf32, #tpu.memory_space<vmem>>, vector<1x128xf32>
    %69 = vector.broadcast %68 : vector<1x128xf32> to vector<8x128xf32>
    %70 = arith.addf %67, %69 : vector<8x128xf32>
    %c0_25 = arith.constant 0 : index
    %c0_26 = arith.constant 0 : index
    %71 = vector.load %arg9[%c0_25, %c0_26] : memref<8x128xf32, #tpu.memory_space<vmem>>, vector<8x128xf32>
    tpu.vector_store %arg9[%c0_25, %c0_26], %70 {strides = array<i32>} : memref<8x128xf32, #tpu.memory_space<vmem>>, vector<8x128xf32>,
    return
  }
  func.func @transform_0(%arg0: i32) -> (i32, i32) {
    %c0_i32 = arith.constant 0 : i32
    %c0_i32_0 = arith.constant 0 : i32
    return %arg0, %c0_i32 : i32, i32
  }
  func.func @transform_1(%arg0: i32) -> (i32, i32) {
    %c0_i32 = arith.constant 0 : i32
    %c0_i32_0 = arith.constant 0 : i32
    return %arg0, %c0_i32 : i32, i32
  }
  func.func @transform_2(%arg0: i32) -> (i32, i32, i32) {
    %c0_i32 = arith.constant 0 : i32
    %c0_i32_0 = arith.constant 0 : i32
    %c0_i32_1 = arith.constant 0 : i32
    %c0_i32_2 = arith.constant 0 : i32
    return %c0_i32, %c0_i32_0, %c0_i32_1 : i32, i32, i32
  }
  func.func @transform_3(%arg0: i32) -> (i32, i32) {
    %c0_i32 = arith.constant 0 : i32
    %c0_i32_0 = arith.constant 0 : i32
    %c0_i32_1 = arith.constant 0 : i32
    return %c0_i32, %c0_i32_0 : i32, i32
  }
  func.func @transform_4(%arg0: i32) -> (i32, i32) {
    %c0_i32 = arith.constant 0 : i32
    %c0_i32_0 = arith.constant 0 : i32
    %c0_i32_1 = arith.constant 0 : i32
    return %c0_i32, %c0_i32_0 : i32, i32
  }
  func.func @transform_5(%arg0: i32) -> (i32, i32) {
    %c0_i32 = arith.constant 0 : i32
    %c0_i32_0 = arith.constant 0 : i32
    %c0_i32_1 = arith.constant 0 : i32
    return %c0_i32, %c0_i32_0 : i32, i32
  }
  func.func @transform_6(%arg0: i32) -> (i32, i32) {
    %c0_i32 = arith.constant 0 : i32
    %c0_i32_0 = arith.constant 0 : i32
    return %arg0, %c0_i32 : i32, i32
  }
  func.func @transform_7(%arg0: i32) -> (i32, i32, i32) {
    %c0_i32 = arith.constant 0 : i32
    %c0_i32_0 = arith.constant 0 : i32
    %c0_i32_1 = arith.constant 0 : i32
    return %arg0, %c0_i32, %c0_i32_0 : i32, i32, i32
  }
  func.func @transform_8(%arg0: i32) -> (i32, i32) {
    %c0_i32 = arith.constant 0 : i32
    %c0_i32_0 = arith.constant 0 : i32
    return %arg0, %c0_i32 : i32, i32
  }
}

</mosaic_0001>

<bundles_post_ra>
// kernel: tpu_custom_call.1
= control target key start
LH: loop header
LB: loop body
LE: loop exit
PB: predicated region body
PF: predicated region fallthrough
CT: control target
= control target key end

     0   :  { %14 = vsyncpa [#allocation3], 0  ;;  %s1782_s0 = inlined_call_operand.hbm [shape: f32[8,128], index: 0, kind: input, shape index: {}]   ;;  %s1783_s1 = inlined_call_operand.hbm [shape: f32[8,128], index: 1, kind: input, shape index: {}]   ;;  %s1784_s2 = inlined_call_operand.hbm [shape: f32[3,32,128], index: 2, kind: input, shape index: {}]   ;;  %s1785_s3 = inlined_call_operand.vmem [shape: f32[4,128], index: 3, kind: input, shape index: {}]   ;;  %s1786_s4 = inlined_call_operand.hbm [shape: f32[128,128], index: 4, kind: input, shape index: {}]   ;;  %s1787_s5 = inlined_call_operand.vmem [shape: f32[1,128], index: 5, kind: input, shape index: {}]   ;;  %s1788_s6 = inlined_call_operand.hbm [shape: f32[8,128], index: 6, kind: output, shape index: {0}]   ;;  %s1789_s7 = inlined_call_operand.hbm [shape: f32[8,32,128], index: 7, kind: output, shape index: {1}]   ;;  %s1790_s8 = inlined_call_operand.hbm [shape: f32[8,128], index: 8, kind: output, shape index: {2}]  }
   0x1   :  { %15 = vsyncpa [#allocation6], 0 }
   0x2   :  { %16 = vsyncpa [#allocation9], 0 }
   0x3   :  { %17 = vsyncpa [#allocation4], 0 }
   0x4   :  { %18 = vsyncpa [#allocation12], 0  ;;  %s1341_s27 = smov [#allocation5]   ;;  %s1342_s29 = smov [#allocation2]  }
   0x5   :  { %s35_s28 = sshll.u32 %s1341_s27, 4  ;;  %s25_s30 = sshll.u32 %s1342_s29, 4  ;;  %s36_s28 = int_to_ptr.vmem [resolvable:$true] %s35_s28  ;;  %s26_s30 = int_to_ptr.vmem [resolvable:$true] %s25_s30 }
   0x6   :  { %s1199_s9 = scalar_lea.vmem %s36_s28, 128  ;;  %p1204_p1 = scmp.lt.s32.totalorder %s36_s28, %s36_s28 }
   0x7   :  { %p1200_p0 = scmp.ne.s32.totalorder %s36_s28, %s1199_s9  ;;  %p1205_p2 = scmp.lt.s32.totalorder %s1199_s9, %s1199_s9 }
   0x9   :  { %p1206_p3 = por %p1205_p2, %p1204_p1 }
   0xb   :  { %p1207_p4 = pnand %p1206_p3, %p1200_p0 }
   0xd   :  { %1210 = shalt.err (!%p1207_p4)
}
   0xe   :  { %38 = dma.hbm_to_vmem [thread:$0]  %s1783_s1, 128, %s36_s28, [#allocation6]  }
   0xf   :  { %s1219_s12 = scalar_lea.vmem %s26_s30, 128  ;;  %p1224_p6 = scmp.lt.s32.totalorder %s26_s30, %s26_s30 }
  0x10   :  { %p1220_p5 = scmp.ne.s32.totalorder %s26_s30, %s1219_s12  ;;  %p1225_p7 = scmp.lt.s32.totalorder %s1219_s12, %s1219_s12 }
  0x12   :  { %p1226_p8 = por %p1225_p7, %p1224_p6 }
  0x14   :  { %p1227_p9 = pnand %p1226_p8, %p1220_p5 }
  0x16   :  { %1230 = shalt.err (!%p1227_p9)
}
  0x17   :  { %28 = dma.hbm_to_vmem [thread:$0]  %s1782_s0, 128, %s26_s30, [#allocation3]  }
  0x18   :  { %s1343_s15 = smov [#allocation7]  }
  0x19   :  { %s44_s16 = sshll.u32 %s1343_s15, 4  ;;  %s45_s16 = int_to_ptr.vmem [resolvable:$true] %s44_s16 }
  0x1a   :  { %s1239_s17 = scalar_lea.vmem %s45_s16, 1536  ;;  %p1244_p11 = scmp.lt.s32.totalorder %s45_s16, %s45_s16 }
  0x1b   :  { %p1240_p10 = scmp.ne.s32.totalorder %s45_s16, %s1239_s17  ;;  %p1245_p12 = scmp.lt.s32.totalorder %s1239_s17, %s1239_s17 }
  0x1d   :  { %p1246_p13 = por %p1245_p12, %p1244_p11 }
  0x1f   :  { %p1247_p0 = pnand %p1246_p13, %p1240_p10 }
  0x21   :  { %1250 = shalt.err (!%p1247_p0)
}
  0x22   :  { %s1344_s1 = smov 128   ;;  %s1345_s18 = smov 8  }
  0x23   :  { %50 = dma.hbm_to_vmem [thread:$0]  %s1784_s2, 1536, %s45_s16, [#allocation6], %s1344_s1, %s1344_s1, %s1345_s18  }
  0x24   :  { %s1346_s0 = smov [#allocation8]  }
  0x25   :  { %s58_s21 = sshll.u32 %s1346_s0, 4  ;;  %s59_s21 = int_to_ptr.vmem [resolvable:$true] %s58_s21 }
  0x26   :  { %s1259_s22 = scalar_lea.vmem %s59_s21, 2048  ;;  %p1264_p2 = scmp.lt.s32.totalorder %s59_s21, %s59_s21 }
  0x27   :  { %p1260_p1 = scmp.ne.s32.totalorder %s59_s21, %s1259_s22  ;;  %p1265_p3 = scmp.lt.s32.totalorder %s1259_s22, %s1259_s22 }
  0x29   :  { %p1266_p4 = por %p1265_p3, %p1264_p2 }
  0x2b   :  { %p1267_p5 = pnand %p1266_p4, %p1260_p1 }
  0x2d   :  { %1270 = shalt.err (!%p1267_p5)
}
  0x2e   :  { %64 = dma.hbm_to_vmem [thread:$0]  %s1786_s4, 2048, %s59_s21, [#allocation9], %s1344_s1, %s1344_s1, %s1345_s18  }
  0x2f   :  { %1331 = dma.done.wait [#allocation3], 128  }
  0x30   :  { %1332 = vsyncadd [#allocation3], 4294967168 }
  0x31   :  { %1333 = dma.done.wait [#allocation6], 1664  }
  0x32   :  { %1334 = vsyncadd [#allocation6], 4294965632 }
  0x33   :  { %1335 = dma.done.wait [#allocation9], 2048  }
  0x34   :  { %1336 = vsyncadd [#allocation9], 4294965248  ;;  %v81_v0 = vlaneseq  ;;  %v1423_v4 = vld [vmem:[#allocation2] sm:$0xff]  ;;  %v91_v9 = vld [vmem:[#allocation5] sm:$0xff]  ;;  %v1347_v10 = vmov 1966171168  }
  0x35   :  { %v1428_v5 = vld [vmem:[%s1785_s3] sm:$0xf]  ;;  %v133_v11 = vunpack.c.l.s4 %v1347_v10  ;;  %v131_v17 = vcombine.high %v1423_v4, %v1423_v4  ;;  %v1449_v22 = vld [vmem:[#allocation7 + $0x8] sm:$0xff]  ;;  %v1454_v26 = vld [vmem:[#allocation7 + $0x18] sm:$0xff]  ;;  %vm1349_vm2 = vmmov 0   ;;  %vm801_vm5 = vcmask 1041409  }
  0x36   :  { %v1417_v1 = vshrl.u32 %v81_v0, 7  ;;  %v1452_v24 = vld [vmem:[#allocation7 + $0x10] sm:$0xff]  ;;  %v1461_v30 = vld [vmem:[#allocation7 + $0x28] sm:$0xff]  ;;  %v1473_v37 = vld [vmem:[#allocation7 + $0x38] sm:$0xff]  ;;  %vm804_vm6 = vcmask 1042434   ;;  %vm807_vm7 = vcmask 1043459  }
  0x37   :  { %v134_v14 = vunpack.c.0.s8 %v133_v11  ;;  %v1465_v33 = vld [vmem:[#allocation7 + $0x30] sm:$0xff]  ;;  %vm810_vm8 = vcmask 1044484   ;;  %vm813_vm9 = vcmask 1045509   ;;  %vm816_vm10 = vcmask 1046534   ;;  %s1350_s3 = smov [#allocation11]  }
  0x38   :  { %v1420_v2 = vsub.s32 0, %v1417_v1  ;;  %v88_v3 = vsub.s32 1, %v1417_v1  ;;  %vm481_vm3 = vcmp.gt.s32.totalorder %v1417_v1, 0  ;;  %vm819_vm11 = vcmask 1047559   ;;  %s933_s4 = sshll.u32 %s1350_s3, 4  ;;  %s934_s4 = int_to_ptr.vmem [resolvable:$true] %s933_s4 }
  0x39   :  { %v1438_v15 = vsub.s32 %v134_v14, %v1417_v1  ;;  %s1271_s26 = scalar_lea.vmem %s934_s4, 4096  ;;  %p1276_p7 = scmp.lt.s32.totalorder %s934_s4, %s934_s4 }
  0x3a   :  { %v84_v6 = vrot.slane %v1428_v5, %v1420_v2  ;;  %v89_v7 = vrot.slane %v1428_v5, %v88_v3  ;;  %p1272_p6 = scmp.ne.s32.totalorder %s934_s4, %s1271_s26  ;;  %p1277_p8 = scmp.lt.s32.totalorder %s1271_s26, %s1271_s26 }
  0x3b   :  { %v138_v16 = vrot.slane %v1423_v4, %v1438_v15  ;;  %v145_v20 = vrot.slane %v131_v17, %v1438_v15 }
  0x3c   :  { %v85_v8 = vmul.f32 %v84_v6, %v1423_v4  ;;  %p1278_p9 = por %p1277_p8, %p1276_p7 }
  0x3d   :  { %v154_v18 = vrot.slane %v138_v16, %v1438_v15  ;;  %v146_v19 = vcombine.high %v138_v16, %v138_v16  ;;  %v147_v27 = vcombine.high %v145_v20, %v145_v20  ;;  %v161_v34 = vrot.slane %v145_v20, %v1438_v15 }
  0x3e   :  { %v90_v12 = vadd.f32 %v89_v7, %v85_v8  ;;  %p1279_p10 = pnand %p1278_p9, %p1272_p6 }
  0x3f   :  { %v1447_v21 = vrot.slane %v154_v18, %v1420_v2  ;;  %v168_v23 = vrot.slane %v146_v19, %v1438_v15  ;;  %v176_v25 = vcombine.high %v154_v18, %v154_v18  ;;  %v175_v38 = vrot.slane %v147_v27, %v1438_v15 }
  0x40   :  { %v1434_v13 = vadd.f32 %v91_v9, %v90_v12  ;;  %v177_v45 = vcombine.high %v161_v34, %v161_v34  ;;  %v1494_v51 = vrot.slane %v161_v34, %v1420_v2 }
  0x41   :  { %v1457_v28 = vrot.slane %v168_v23, %v1420_v2  ;;  %v221_v29 = vmul.f32 %v1447_v21, %v1449_v22  ;;  %v178_v31 = vcombine.high %v168_v23, %v168_v23  ;;  %v222_v32 = vmul.f32 %v1447_v21, %v1452_v24 }
  0x42   :  { %93 = vmax.xlane.f32.xlu0 %v1434_v13  ;;  %v1469_v35 = vrot.slane %v176_v25, %v1420_v2  ;;  %v223_v36 = vmul.f32 %v1447_v21, %v1454_v26  ;;  %v179_v48 = vcombine.high %v175_v38, %v175_v38  ;;  %v1500_v55 = vrot.slane %v175_v38, %v1420_v2 }
  0x43   :  { %v225_v39 = vmul.f32 %v1457_v28, %v1449_v22  ;;  %v226_v40 = vmul.f32 %v1457_v28, %v1452_v24  ;;  %v253_v41 = vadd.f32 %v221_v29, %v1461_v30  ;;  %v1482_v42 = vrot.slane %v178_v31, %v1420_v2 }
  0x44   :  { %v227_v43 = vmul.f32 %v1457_v28, %v1454_v26  ;;  %v254_v44 = vadd.f32 %v222_v32, %v1465_v33  ;;  %v229_v46 = vmul.f32 %v1469_v35, %v1449_v22  ;;  %v255_v47 = vadd.f32 %v223_v36, %v1473_v37 }
  0x45   :  { %v230_v49 = vmul.f32 %v1469_v35, %v1452_v24  ;;  %v257_v50 = vadd.f32 %v225_v39, %v1461_v30  ;;  %v231_v52 = vmul.f32 %v1469_v35, %v1454_v26  ;;  %v258_v53 = vadd.f32 %v226_v40, %v1465_v33 }
  0x46   :  { %v966_v54 = vmul.f32 -1.442695, %v253_v41  ;;  %v233_v56 = vmul.f32 %v1482_v42, %v1449_v22  ;;  %v259_v57 = vadd.f32 %v227_v43, %v1473_v37  ;;  %v967_v58 = vmul.f32 -1.442695, %v254_v44 }
  0x47   :  { %v1506_v59 = vrot.slane %v177_v45, %v1420_v2  ;;  %v234_v60 = vmul.f32 %v1482_v42, %v1452_v24  ;;  %v261_v61 = vadd.f32 %v229_v46, %v1461_v30  ;;  %v968_v62 = vmul.f32 -1.442695, %v255_v47 }
  0x48   :  { %v1512_v63 = vrot.slane %v179_v48, %v1420_v2  ;;  %v235_v3 = vmul.f32 %v1482_v42, %v1454_v26  ;;  %v262_v6 = vadd.f32 %v230_v49, %v1465_v33  ;;  %v970_v7 = vmul.f32 -1.442695, %v257_v50 }
  0x49   :  { %v237_v8 = vmul.f32 %v1494_v51, %v1449_v22  ;;  %v263_v9 = vadd.f32 %v231_v52, %v1473_v37  ;;  %1063 = vpow2.f32 %v966_v54  ;;  %v971_v10 = vmul.f32 -1.442695, %v258_v53 }
  0x4a   :  { %v238_v11 = vmul.f32 %v1494_v51, %v1452_v24  ;;  %v265_v12 = vadd.f32 %v233_v56, %v1461_v30  ;;  %1065 = vpow2.f32 %v967_v58  ;;  %v972_v14 = vmul.f32 -1.442695, %v259_v57 }
  0x4b   :  { %v239_v16 = vmul.f32 %v1494_v51, %v1454_v26  ;;  %v266_v17 = vadd.f32 %v234_v60, %v1465_v33  ;;  %1067 = vpow2.f32 %v968_v62  ;;  %v974_v18 = vmul.f32 -1.442695, %v261_v61 }
  0x4c   :  { %v241_v19 = vmul.f32 %v1500_v55, %v1449_v22  ;;  %v267_v20 = vadd.f32 %v235_v3, %v1473_v37  ;;  %1069 = vpow2.f32 %v970_v7  ;;  %v975_v23 = vmul.f32 -1.442695, %v262_v6 }
  0x4d   :  { %v242_v25 = vmul.f32 %v1500_v55, %v1452_v24  ;;  %v269_v27 = vadd.f32 %v237_v8, %v1461_v30  ;;  %1071 = vpow2.f32 %v971_v10  ;;  %v976_v29 = vmul.f32 -1.442695, %v263_v9 }
  0x4e   :  { %v243_v31 = vmul.f32 %v1500_v55, %v1454_v26  ;;  %v270_v32 = vadd.f32 %v238_v11, %v1465_v33  ;;  %1073 = vpow2.f32 %v972_v14  ;;  %v978_v34 = vmul.f32 -1.442695, %v265_v12 }
  0x4f   :  { %v245_v36 = vmul.f32 %v1506_v59, %v1449_v22  ;;  %v271_v38 = vadd.f32 %v239_v16, %v1473_v37  ;;  %1075 = vpow2.f32 %v974_v18  ;;  %v979_v39 = vmul.f32 -1.442695, %v266_v17 }
  0x50   :  { %v246_v40 = vmul.f32 %v1506_v59, %v1452_v24  ;;  %v273_v41 = vadd.f32 %v241_v19, %v1461_v30  ;;  %1077 = vpow2.f32 %v975_v23  ;;  %v980_v43 = vmul.f32 -1.442695, %v267_v20 }
  0x51   :  { %v247_v44 = vmul.f32 %v1506_v59, %v1454_v26  ;;  %v274_v45 = vadd.f32 %v242_v25, %v1465_v33  ;;  %1079 = vpow2.f32 %v976_v29  ;;  %v982_v46 = vmul.f32 -1.442695, %v269_v27 }
  0x52   :  { %v249_v47 = vmul.f32 %v1512_v63, %v1449_v22  ;;  %v275_v48 = vadd.f32 %v243_v31, %v1473_v37  ;;  %1081 = vpow2.f32 %v978_v34  ;;  %v983_v49 = vmul.f32 -1.442695, %v270_v32 }
  0x53   :  { %v277_v50 = vadd.f32 %v245_v36, %v1461_v30  ;;  %1083 = vpow2.f32 %v979_v39  ;;  %v984_v52 = vmul.f32 -1.442695, %v271_v38  ;;  %v278_v53 = vadd.f32 %v246_v40, %v1465_v33 }
  0x54   :  { %1085 = vpow2.f32 %v980_v43  ;;  %v986_v54 = vmul.f32 -1.442695, %v273_v41  ;;  %v279_v56 = vadd.f32 %v247_v44, %v1473_v37  ;;  %v987_v57 = vmul.f32 -1.442695, %v274_v45 }
  0x55   :  { %1087 = vpow2.f32 %v982_v46  ;;  %v250_v22 = vmul.f32 %v1512_v63, %v1452_v24  ;;  %v281_v60 = vadd.f32 %v249_v47, %v1461_v30  ;;  %v988_v61 = vmul.f32 -1.442695, %v275_v48 }
  0x56   :  { %v1064_v58 = vpop.eup %1063  ;;  %1089 = vpow2.f32 %v983_v49  ;;  %v990_v3 = vmul.f32 -1.442695, %v277_v50  ;;  %v991_v7 = vmul.f32 -1.442695, %v278_v53  ;;  %v992_v9 = vmul.f32 -1.442695, %v279_v56 }
  0x57   :  { %v1066_v62 = vpop.eup %1065  ;;  %1091 = vpow2.f32 %v984_v52  ;;  %v251_v11 = vmul.f32 %v1512_v63, %v1454_v26  ;;  %v282_v12 = vadd.f32 %v250_v22, %v1465_v33  ;;  %v994_v24 = vmul.f32 -1.442695, %v281_v60 }
  0x58   :  { %v1068_v6 = vpop.eup %1067  ;;  %1093 = vpow2.f32 %v986_v54  ;;  %v381_v14 = vadd.f32 1.0, %v1064_v58  ;;  %v382_v17 = vadd.f32 1.0, %v1066_v62 }
  0x59   :  { %v1070_v8 = vpop.eup %1069  ;;  %1095 = vpow2.f32 %v987_v57  ;;  %v383_v19 = vadd.f32 1.0, %v1068_v6  ;;  %v283_v23 = vadd.f32 %v251_v11, %v1473_v37  ;;  %v995_v25 = vmul.f32 -1.442695, %v282_v12 }
  0x5a   :  { %v1072_v10 = vpop.eup %1071  ;;  %1097 = vpow2.f32 %v988_v61  ;;  %v385_v26 = vadd.f32 1.0, %v1070_v8 }
  0x5b   :  { %v1074_v30 = vpop.eup %1073  ;;  %1099 = vpow2.f32 %v990_v3  ;;  %v386_v29 = vadd.f32 1.0, %v1072_v10  ;;  %v996_v36 = vmul.f32 -1.442695, %v283_v23 }
  0x5c   :  { %v1076_v16 = vpop.eup %1075  ;;  %1101 = vpow2.f32 %v991_v7  ;;  %v387_v32 = vadd.f32 1.0, %v1074_v30 }
  0x5d   :  { %v1078_v18 = vpop.eup %1077  ;;  %1103 = vpow2.f32 %v992_v9  ;;  %v389_v39 = vadd.f32 1.0, %v1076_v16 }
  0x5e   :  { %v1080_v20 = vpop.eup %1079  ;;  %1105 = vpow2.f32 %v994_v24  ;;  %v390_v41 = vadd.f32 1.0, %v1078_v18 }
  0x5f   :  { %v1082_v27 = vpop.eup %1081  ;;  %1107 = vrcp.f32 %v381_v14  ;;  %v391_v43 = vadd.f32 1.0, %v1080_v20 }
  0x60   :  { %v1084_v33 = vpop.eup %1083  ;;  %1109 = vrcp.f32 %v382_v17  ;;  %v393_v46 = vadd.f32 1.0, %v1082_v27 }
  0x61   :  { %v1086_v31 = vpop.eup %1085  ;;  %1111 = vrcp.f32 %v383_v19  ;;  %v394_v48 = vadd.f32 1.0, %v1084_v33 }
  0x62   :  { %v1088_v34 = vpop.eup %1087  ;;  %1113 = vpow2.f32 %v995_v25  ;;  %v395_v50 = vadd.f32 1.0, %v1086_v31 }
  0x63   :  { %v1090_v38 = vpop.eup %1089  ;;  %1115 = vrcp.f32 %v385_v26  ;;  %v397_v54 = vadd.f32 1.0, %v1088_v34 }
  0x64   :  { %v1092_v40 = vpop.eup %1091  ;;  %1117 = vrcp.f32 %v386_v29  ;;  %v398_v57 = vadd.f32 1.0, %v1090_v38 }
  0x65   :  { %v1094_v37 = vpop.eup %1093  ;;  %1119 = vrcp.f32 %v387_v32  ;;  %v399_v22 = vadd.f32 1.0, %v1092_v40 }
  0x66   :  { %v1096_v44 = vpop.eup %1095  ;;  %1121 = vpow2.f32 %v996_v36  ;;  %v401_v62 = vadd.f32 1.0, %v1094_v37  ;;  %v1630_v37 = vand.u32 127, %v81_v0  ;;  %v836_v0 = vld [vmem:[#allocation8 + $0x60] sm:$0xff] }
  0x67   :  { %v1098_v45 = vpop.eup %1097  ;;  %1123 = vrcp.f32 %v389_v39  ;;  %v402_v6 = vadd.f32 1.0, %v1096_v44 }
  0x68   :  { %v1100_v47 = vpop.eup %1099  ;;  %1125 = vrcp.f32 %v390_v41  ;;  %v403_v8 = vadd.f32 1.0, %v1098_v45 }
  0x69   :  { %v1102_v49 = vpop.eup %1101  ;;  %1127 = vrcp.f32 %v391_v43  ;;  %v405_v11 = vadd.f32 1.0, %v1100_v47  ;;  %v839_v47 = vld [vmem:[#allocation8 + $0x78] sm:$0xff] }
  0x6a   :  { %v1104_v52 = vpop.eup %1103  ;;  %1129 = vrcp.f32 %v393_v46  ;;  %v406_v24 = vadd.f32 1.0, %v1102_v49  ;;  %v838_v49 = vld [vmem:[#allocation8 + $0x70] sm:$0xff] }
  0x6b   :  { %v1106_v53 = vpop.eup %1105  ;;  %1131 = vrcp.f32 %v394_v48  ;;  %v407_v14 = vadd.f32 1.0, %v1104_v52  ;;  %v1348_v48 = vmov 0.0   ;;  %v834_v52 = vld [vmem:[#allocation8 + $0x50] sm:$0xff] }
  0x6c   :  { %v1557_v56 = vpop.eup %1107  ;;  %1133 = vrcp.f32 %v395_v50  ;;  %v409_v17 = vadd.f32 1.0, %v1106_v53  ;;  %1015 = vmatprep.subr.mxu0 %v1348_v48  ;;  %v837_v50 = vld [vmem:[#allocation8 + $0x68] sm:$0xff]  ;;  %1047 = vmatprep.mubr.msk.f32.mxu0 %vm1349_vm2, %v1348_v48 }
  0x6d   :  { %v1559_v58 = vpop.eup %1109  ;;  %616 = vst [vmem:[#allocation11 + $0x8] sm:$0xff] %v1557_v56  ;;  %1135 = vrcp.f32 %v397_v54  ;;  %1016 = vmatpush3.msra.mxu0 %v839_v47  ;;  %v833_v53 = vld [vmem:[#allocation8 + $0x48] sm:$0xff]  ;;  %v832_v54 = vld [vmem:[#allocation8 + $0x40] sm:$0xff] }
  0x6e   :  { %v1562_v60 = vpop.eup %1111  ;;  %617 = vst [vmem:[#allocation11 + $0x10] sm:$0xff] %v1559_v58  ;;  %1137 = vrcp.f32 %v398_v57  ;;  %1017 = vmatprep.subr.mxu0 %v1348_v48  ;;  %v831_v57 = vld [vmem:[#allocation8 + $0x38] sm:$0xff] }
  0x6f   :  { %v1114_v61 = vpop.eup %1113  ;;  %618 = vst [vmem:[#allocation11 + $0x18] sm:$0xff] %v1562_v60  ;;  %1139 = vrcp.f32 %v399_v22  ;;  %1018 = vmatpush3.msra.mxu0 %v838_v49  ;;  %v830_v22 = vld [vmem:[#allocation8 + $0x30] sm:$0xff] }
  0x70   :  { %v1566_v3 = vpop.eup %1115  ;;  %1141 = vrcp.f32 %v401_v62  ;;  %v410_v19 = vadd.f32 1.0, %v1114_v61  ;;  %1019 = vmatprep.subr.mxu0 %v1348_v48  ;;  %v829_v61 = vld [vmem:[#allocation8 + $0x28] sm:$0xff]  ;;  %v828_v62 = vld [vmem:[#allocation8 + $0x20] sm:$0xff] }
  0x71   :  { %v1568_v7 = vpop.eup %1117  ;;  %620 = vst [vmem:[#allocation11 + $0x28] sm:$0xff] %v1566_v3  ;;  %1143 = vrcp.f32 %v402_v6  ;;  %1020 = vmatpush3.msra.mxu0 %v837_v50 }
  0x72   :  { %v1571_v9 = vpop.eup %1119  ;;  %621 = vst [vmem:[#allocation11 + $0x30] sm:$0xff] %v1568_v7  ;;  %1145 = vrcp.f32 %v403_v8  ;;  %1021 = vmatprep.subr.mxu0 %v1348_v48 }
  0x73   :  { %v1122_v10 = vpop.eup %1121  ;;  %622 = vst [vmem:[#allocation11 + $0x38] sm:$0xff] %v1571_v9  ;;  %1147 = vrcp.f32 %v405_v11  ;;  %1022 = vmatpush3.msra.mxu0 %v836_v0 }
  0x74   :  { %v1575_v12 = vpop.eup %1123  ;;  %1149 = vrcp.f32 %v406_v24  ;;  %v411_v23 = vadd.f32 1.0, %v1122_v10  ;;  %1023 = vmatprep.subr.mxu0 %v1348_v48  ;;  %v827_v24 = vld [vmem:[#allocation8 + $0x18] sm:$0xff] }
  0x75   :  { %v1577_v30 = vpop.eup %1125  ;;  %624 = vst [vmem:[#allocation11 + $0x48] sm:$0xff] %v1575_v12  ;;  %1151 = vrcp.f32 %v407_v14  ;;  %v826_v14 = vld [vmem:[#allocation8 + $0x10] sm:$0xff] }
  0x76   :  { %v1580_v16 = vpop.eup %1127  ;;  %625 = vst [vmem:[#allocation11 + $0x50] sm:$0xff] %v1577_v30  ;;  %1153 = vrcp.f32 %v409_v17  ;;  %v825_v17 = vld [vmem:[#allocation8 + $0x8] sm:$0xff] }
  0x77   :  { %626 = vst [vmem:[#allocation11 + $0x58] sm:$0xff] %v1580_v16  ;;  %v1584_v18 = vpop.eup %1129  ;;  %1155 = vrcp.f32 %v410_v19  ;;  %v824_v19 = vld [vmem:[#allocation8] sm:$0xff] }
  0x78   :  { %v1586_v20 = vpop.eup %1131  ;;  %628 = vst [vmem:[#allocation11 + $0x68] sm:$0xff] %v1584_v18  ;;  %1157 = vrcp.f32 %v411_v23  ;;  %v116_v23 = vld [vmem:[#allocation7] sm:$0xff] }
  0x79   :  { %v1589_v25 = vpop.eup %1133  ;;  %629 = vst [vmem:[#allocation11 + $0x70] sm:$0xff] %v1586_v20  ;;  %v232_v47 = vmul.f32 %v1482_v42, %v116_v23  ;;  %v236_v49 = vmul.f32 %v1494_v51, %v116_v23  ;;  %v240_v0 = vmul.f32 %v1500_v55, %v116_v23 }
  0x7a   :  { %630 = vst [vmem:[#allocation11 + $0x78] sm:$0xff] %v1589_v25  ;;  %v1593_v27 = vpop.eup %1135 }
  0x7b   :  { %v1595_v26 = vpop.eup %1137  ;;  %632 = vst [vmem:[#allocation11 + $0x88] sm:$0xff] %v1593_v27 }
  0x7c   :  { %v1598_v33 = vpop.eup %1139  ;;  %633 = vst [vmem:[#allocation11 + $0x90] sm:$0xff] %v1595_v26 }
  0x7d   :  { %634 = vst [vmem:[#allocation11 + $0x98] sm:$0xff] %v1598_v33  ;;  %v1602_v29 = vpop.eup %1141 }
  0x7e   :  { %v1604_v31 = vpop.eup %1143  ;;  %636 = vst [vmem:[#allocation11 + $0xa8] sm:$0xff] %v1602_v29 }
  0x7f   :  { %v1607_v32 = vpop.eup %1145  ;;  %637 = vst [vmem:[#allocation11 + $0xb0] sm:$0xff] %v1604_v31 }
  0x80   :  { %638 = vst [vmem:[#allocation11 + $0xb8] sm:$0xff] %v1607_v32  ;;  %v1611_v34 = vpop.eup %1147 }
  0x81   :  { %v1613_v36 = vpop.eup %1149  ;;  %640 = vst [vmem:[#allocation11 + $0xc8] sm:$0xff] %v1611_v34 }
  0x82   :  { %v1616_v38 = vpop.eup %1151  ;;  %641 = vst [vmem:[#allocation11 + $0xd0] sm:$0xff] %v1613_v36 }
  0x83   :  { %642 = vst [vmem:[#allocation11 + $0xd8] sm:$0xff] %v1616_v38  ;;  %v1620_v39 = vpop.eup %1153 }
  0x84   :  { %v1622_v40 = vpop.eup %1155  ;;  %644 = vst [vmem:[#allocation11 + $0xe8] sm:$0xff] %v1620_v39 }
  0x85   :  { %v1625_v41 = vpop.eup %1157  ;;  %645 = vst [vmem:[#allocation11 + $0xf0] sm:$0xff] %v1622_v40 }
  0x86   :  { %646 = vst [vmem:[#allocation11 + $0xf8] sm:$0xff] %v1625_v41 }
  0xcb   :  { %v94_v43 = vpop.xlane.xlu0 %93 }
  0xcc   :  { %vm97_vm0 = vcmp.ge.f32.partialorder %v1434_v13, %v94_v43  ;;  %v835_v13 = vld [vmem:[#allocation8 + $0x58] sm:$0xff]  ;;  %v220_v43 = vmul.f32 %v1447_v21, %v116_v23 }
  0xcd   :  { %v98_v44 = vsel %vm97_vm0, %v1630_v37, 1073741824  ;;  %1024 = vmatpush3.msra.mxu0 %v835_v13 }
  0xce   :  { %v100_v45 = vshra.s32 %v98_v44, 16  ;;  %1025 = vmatprep.subr.mxu0 %v1348_v48  ;;  %v99_v6 = vand.u32 65535, %v98_v44  ;;  %v121_v44 = vld [vmem:[#allocation7 + $0x20] sm:$0xff] }
  0xcf   :  { %1026 = vmatpush3.msra.mxu0 %v834_v52  ;;  %v252_v50 = vadd.f32 %v220_v43, %v121_v44  ;;  %v244_v52 = vmul.f32 %v1506_v59, %v116_v23  ;;  %v268_v21 = vadd.f32 %v236_v49, %v121_v44 }
  0xd0   :  { %v102_v46 = vcvt.s32.f32 %v100_v45  ;;  %1027 = vmatprep.subr.mxu0 %v1348_v48  ;;  %v101_v10 = vcvt.s32.f32 %v99_v6  ;;  %v224_v45 = vmul.f32 %v1457_v28, %v116_v23 }
  0xd1   :  { %1028 = vmatpush3.msra.mxu0 %v833_v53  ;;  %v981_v51 = vmul.f32 -1.442695, %v268_v21 }
  0xd2   :  { %103 = vmin.xlane.f32.xlu0 %v102_v46  ;;  %1029 = vmatprep.subr.mxu0 %v1348_v48  ;;  %v256_v13 = vadd.f32 %v224_v45, %v121_v44 }
  0xd3   :  { %1030 = vmatpush3.msra.mxu0 %v832_v54  ;;  %v248_v54 = vmul.f32 %v1512_v63, %v116_v23 }
  0xd4   :  { %1031 = vmatprep.subr.mxu0 %v1348_v48  ;;  %v969_v28 = vmul.f32 -1.442695, %v256_v13 }
  0xd5   :  { %1032 = vmatpush3.msra.mxu0 %v831_v57  ;;  %v264_v57 = vadd.f32 %v232_v47, %v121_v44  ;;  %v280_v6 = vadd.f32 %v248_v54, %v121_v44 }
  0xd6   :  { %1033 = vmatprep.subr.mxu0 %v1348_v48 }
  0xd7   :  { %1034 = vmatpush3.msra.mxu0 %v830_v22  ;;  %v965_v22 = vmul.f32 -1.442695, %v252_v50  ;;  %v977_v42 = vmul.f32 -1.442695, %v264_v57  ;;  %v993_v59 = vmul.f32 -1.442695, %v280_v6 }
  0xd8   :  { %1035 = vmatprep.subr.mxu0 %v1348_v48 }
  0xd9   :  { %1036 = vmatpush3.msra.mxu0 %v829_v61  ;;  %v272_v61 = vadd.f32 %v240_v0, %v121_v44  ;;  %1159 = vpow2.f32 %v965_v22  ;;  %v126_v22 = vld [vmem:[#allocation7 + $0x40] sm:$0xff] }
  0xda   :  { %1037 = vmatprep.subr.mxu0 %v1348_v48  ;;  %1161 = vpow2.f32 %v969_v28 }
  0xdb   :  { %1038 = vmatpush3.msra.mxu0 %v828_v62  ;;  %v276_v62 = vadd.f32 %v244_v52, %v121_v44 }
  0xdc   :  { %1039 = vmatprep.subr.mxu0 %v1348_v48 }
  0xdd   :  { %1040 = vmatpush3.msra.mxu0 %v827_v24  ;;  %v989_v55 = vmul.f32 -1.442695, %v276_v62 }
  0xde   :  { %1041 = vmatprep.subr.mxu0 %v1348_v48 }
  0xdf   :  { %1042 = vmatpush3.msra.mxu0 %v826_v14 }
  0xe0   :  { %1043 = vmatprep.subr.mxu0 %v1348_v48 }
  0xe1   :  { %1044 = vmatpush3.msra.mxu0 %v825_v17 }
  0xe2   :  { %1045 = vmatprep.subr.mxu0 %v1348_v48 }
  0xe3   :  { %1046 = vmatpush3.msra.mxu0 %v824_v19 }
  0xe6   :  { %v1160_v63 = vpop.eup %1159 }
  0xe7   :  { %v380_v17 = vadd.f32 1.0, %v1160_v63 }
 0x15b   :  { %v1647_v8 = vpop.xlane.xlu0 %103 }
 0x15c   :  { %vm105_vm1 = vcmp.eq.f32.partialorder %v102_v46, %v1647_v8  ;;  %v228_v46 = vmul.f32 %v1469_v35, %v116_v23 }
 0x15d   :  { %v106_v11 = vsel %vm105_vm1, %v101_v10, inf  ;;  %v985_v10 = vmul.f32 -1.442695, %v272_v61  ;;  %v127_v61 = vld [vmem:[#allocation7 + $0x48] sm:$0xff] }
 0x15e   :  { %107 = vmin.xlane.f32.xlu1 %v106_v11  ;;  %v260_v53 = vadd.f32 %v228_v46, %v121_v44  ;;  %v1162_v11 = vpop.eup %1161  ;;  %v656_v63 = vmul.f32 %v1575_v12, %v127_v61  ;;  %v676_v12 = vmul.f32 %v1620_v39, %v127_v61 }
 0x15f   :  { %v384_v23 = vadd.f32 1.0, %v1162_v11 }
 0x160   :  { %v973_v35 = vmul.f32 -1.442695, %v260_v53 }
 0x162   :  { %1163 = vpow2.f32 %v973_v35 }
 0x163   :  { %1165 = vpow2.f32 %v977_v42  ;;  %v648_v42 = vmul.f32 %v1557_v56, %v127_v61  ;;  %v668_v56 = vmul.f32 %v1602_v29, %v127_v61 }
 0x164   :  { %1167 = vpow2.f32 %v981_v51 }
 0x165   :  { %1169 = vpow2.f32 %v985_v10  ;;  %v652_v10 = vmul.f32 %v1566_v3, %v127_v61  ;;  %v672_v3 = vmul.f32 %v1611_v34, %v127_v61 }
 0x166   :  { %1171 = vpow2.f32 %v989_v55  ;;  %v128_v55 = vld [vmem:[#allocation7 + $0x50] sm:$0xff] }
 0x167   :  { %1173 = vpow2.f32 %v993_v59  ;;  %v669_v34 = vmul.f32 %v1604_v31, %v128_v55  ;;  %v677_v39 = vmul.f32 %v1622_v40, %v128_v55 }
 0x168   :  { %1175 = vrcp.f32 %v380_v17  ;;  %v664_v17 = vmul.f32 %v1593_v27, %v127_v61  ;;  %v129_v27 = vld [vmem:[#allocation7 + $0x58] sm:$0xff] }
 0x169   :  { %1177 = vrcp.f32 %v384_v23  ;;  %v670_v40 = vmul.f32 %v1607_v32, %v129_v27 }
 0x16f   :  { %v1164_v24 = vpop.eup %1163 }
 0x170   :  { %v1166_v14 = vpop.eup %1165  ;;  %v388_v44 = vadd.f32 1.0, %v1164_v24  ;;  %v660_v24 = vmul.f32 %v1584_v18, %v127_v61  ;;  %v653_v18 = vmul.f32 %v1568_v7, %v128_v55 }
 0x171   :  { %v1168_v19 = vpop.eup %1167  ;;  %v392_v46 = vadd.f32 1.0, %v1166_v14 }
 0x172   :  { %v1170_v43 = vpop.eup %1169  ;;  %v396_v49 = vadd.f32 1.0, %v1168_v19  ;;  %1179 = vrcp.f32 %v388_v44  ;;  %v649_v44 = vmul.f32 %v1559_v58, %v128_v55 }
 0x173   :  { %v1172_v45 = vpop.eup %1171  ;;  %v400_v50 = vadd.f32 1.0, %v1170_v43  ;;  %1181 = vrcp.f32 %v392_v46 }
 0x174   :  { %v1174_v47 = vpop.eup %1173  ;;  %v404_v0 = vadd.f32 1.0, %v1172_v45  ;;  %1183 = vrcp.f32 %v396_v49  ;;  %v657_v45 = vmul.f32 %v1577_v30, %v128_v55  ;;  %v650_v30 = vmul.f32 %v1562_v60, %v129_v27 }
 0x175   :  { %v408_v13 = vadd.f32 1.0, %v1174_v47  ;;  %1185 = vrcp.f32 %v400_v50  ;;  %v1662_v52 = vpop.eup %1175  ;;  %v661_v47 = vmul.f32 %v1586_v20, %v128_v55  ;;  %v658_v20 = vmul.f32 %v1580_v16, %v129_v27 }
 0x176   :  { %1187 = vrcp.f32 %v404_v0  ;;  %v1664_v53 = vpop.eup %1177  ;;  %v647_v6 = vmul.f32 %v1662_v52, %v126_v22  ;;  %v665_v0 = vmul.f32 %v1595_v26, %v128_v55 }
 0x177   :  { %1189 = vrcp.f32 %v408_v13  ;;  %v651_v51 = vmul.f32 %v1664_v53, %v126_v22  ;;  %v673_v13 = vmul.f32 %v1613_v36, %v128_v55  ;;  %v666_v36 = vmul.f32 %v1598_v33, %v129_v27 }
 0x178   :  { %v679_v46 = vadd.f32 %v648_v42, %v647_v6  ;;  %v654_v6 = vmul.f32 %v1571_v9, %v129_v27  ;;  %v674_v55 = vmul.f32 %v1616_v38, %v129_v27 }
 0x179   :  { %v688_v49 = vadd.f32 %v652_v10, %v651_v51  ;;  %v662_v51 = vmul.f32 %v1589_v25, %v129_v27 }
 0x17a   :  { %v680_v42 = vadd.f32 %v679_v46, %v649_v44 }
 0x17b   :  { %v689_v26 = vadd.f32 %v688_v49, %v653_v18 }
 0x17d   :  { %v690_v16 = vadd.f32 %v689_v26, %v654_v6  ;;  %v753_v26 = vsub.s32 2, %v1417_v1 }
 0x17f   :  { %v1666_v54 = vpop.eup %1179  ;;  %v691_v33 = vrot.slane %v690_v16, 4 }
 0x180   :  { %v1668_v57 = vpop.eup %1181  ;;  %v655_v59 = vmul.f32 %v1666_v54, %v126_v22 }
 0x181   :  { %v1670_v21 = vpop.eup %1183  ;;  %v659_v11 = vmul.f32 %v1668_v57, %v126_v22 }
 0x182   :  { %v1672_v28 = vpop.eup %1185  ;;  %v663_v14 = vmul.f32 %v1670_v21, %v126_v22  ;;  %v697_v29 = vadd.f32 %v656_v63, %v655_v59  ;;  %v678_v59 = vmul.f32 %v1625_v41, %v129_v27 }
 0x183   :  { %v1674_v62 = vpop.eup %1187  ;;  %v667_v19 = vmul.f32 %v1672_v28, %v126_v22  ;;  %v706_v50 = vadd.f32 %v660_v24, %v659_v11  ;;  %v681_v24 = vadd.f32 %v680_v42, %v650_v30  ;;  %v110_v30 = vcvt.f32.s32 %v1647_v8 }
 0x184   :  { %v1676_v35 = vpop.eup %1189  ;;  %v671_v23 = vmul.f32 %v1674_v62, %v126_v22  ;;  %v715_v58 = vadd.f32 %v664_v17, %v663_v14  ;;  %v698_v10 = vadd.f32 %v697_v29, %v657_v45  ;;  %v692_v45 = vadd.f32 %v691_v33, %v690_v16 }
 0x185   :  { %v675_v43 = vmul.f32 %v1676_v35, %v126_v22  ;;  %v724_v22 = vadd.f32 %v668_v56, %v667_v19  ;;  %v707_v31 = vadd.f32 %v706_v50, %v661_v47  ;;  %v754_v8 = vrot.slane %v1428_v5, %v753_v26 }
 0x186   :  { %v733_v7 = vadd.f32 %v672_v3, %v671_v23  ;;  %v716_v63 = vadd.f32 %v715_v58, %v665_v0  ;;  %v699_v14 = vadd.f32 %v698_v10, %v658_v20  ;;  %v682_v3 = vrot.slane %v681_v24, 4 }
 0x187   :  { %v742_v61 = vadd.f32 %v676_v12, %v675_v43  ;;  %v725_v60 = vadd.f32 %v724_v22, %v669_v34  ;;  %v708_v17 = vadd.f32 %v707_v31, %v662_v51  ;;  %v693_v34 = vrot.slane %v692_v45, 2 }
 0x188   :  { %v734_v11 = vadd.f32 %v733_v7, %v673_v13  ;;  %v717_v25 = vadd.f32 %v716_v63, %v666_v36  ;;  %v700_v43 = vrot.slane %v699_v14, 4  ;;  %v683_v18 = vadd.f32 %v682_v3, %v681_v24 }
 0x189   :  { %v743_v9 = vadd.f32 %v742_v61, %v677_v39  ;;  %v726_v19 = vadd.f32 %v725_v60, %v670_v40  ;;  %v709_v32 = vrot.slane %v708_v17, 4  ;;  %v694_v20 = vadd.f32 %v693_v34, %v692_v45 }
 0x18a   :  { %v735_v56 = vadd.f32 %v734_v11, %v674_v55  ;;  %v718_v12 = vrot.slane %v717_v25, 4  ;;  %v701_v46 = vadd.f32 %v700_v43, %v699_v14  ;;  %v684_v0 = vrot.slane %v683_v18, 2 }
 0x18b   :  { %v744_v23 = vadd.f32 %v743_v9, %v678_v59  ;;  %v727_v38 = vrot.slane %v726_v19, 4  ;;  %v710_v27 = vadd.f32 %v709_v32, %v708_v17  ;;  %v782_v59 = vsub.s32 3, %v1417_v1 }
 0x18c   :  { %v736_v44 = vrot.slane %v735_v56, 4  ;;  %v719_v47 = vadd.f32 %v718_v12, %v717_v25  ;;  %v702_v13 = vrot.slane %v701_v46, 2  ;;  %v685_v6 = vadd.f32 %v684_v0, %v683_v18 }
 0x18d   :  { %v745_v41 = vrot.slane %v744_v23, 4  ;;  %v728_v49 = vadd.f32 %v727_v38, %v726_v19  ;;  %v711_v39 = vrot.slane %v710_v27, 2  ;;  %v111_v63 = vshll.u32 %v110_v30, 16 }
 0x18e   :  { %v737_v29 = vadd.f32 %v736_v44, %v735_v56  ;;  %v720_v58 = vrot.slane %v719_v47, 2  ;;  %v703_v42 = vadd.f32 %v702_v13, %v701_v46  ;;  %v686_v11 = vrot.slane %v685_v6, 1 }
 0x18f   :  { %v746_v50 = vadd.f32 %v745_v41, %v744_v23  ;;  %v729_v22 = vrot.slane %v728_v49, 2  ;;  %v712_v51 = vadd.f32 %v711_v39, %v710_v27  ;;  %v695_v9 = vrot.slane %v694_v20, 1 }
 0x190   :  { %v738_v7 = vrot.slane %v737_v29, 2  ;;  %v721_v31 = vadd.f32 %v720_v58, %v719_v47  ;;  %v704_v24 = vrot.slane %v703_v42, 1  ;;  %v1715_v23 = vrot.slane %v1428_v5, %v782_v59 }
 0x191   :  { %v747_v61 = vrot.slane %v746_v50, 2  ;;  %v730_v36 = vadd.f32 %v729_v22, %v728_v49  ;;  %v713_v16 = vrot.slane %v712_v51, 1  ;;  %v687_v3 = vadd.f32 %v686_v11, %v685_v6 }
 0x192   :  { %v739_v40 = vadd.f32 %v738_v7, %v737_v29  ;;  %v722_v17 = vrot.slane %v721_v31, 1  ;;  %v696_v43 = vadd.f32 %v695_v9, %v694_v20  ;;  %v705_v32 = vadd.f32 %v704_v24, %v703_v42 }
 0x193   :  { %v748_v55 = vadd.f32 %v747_v61, %v746_v50  ;;  %v731_v25 = vrot.slane %v730_v36, 1  ;;  %v714_v12 = vadd.f32 %v713_v16, %v712_v51 }
 0x194   :  { %v740_v19 = vrot.slane %v739_v40, 1  ;;  %v723_v45 = vadd.f32 %v722_v17, %v721_v31 }
 0x195   :  { %v749_v56 = vrot.slane %v748_v55, 1  ;;  %v732_v46 = vadd.f32 %v731_v25, %v730_v36 }
 0x196   :  { %v741_v5 = vadd.f32 %v740_v19, %v739_v40 }
 0x197   :  { %v750_v27 = vadd.f32 %v749_v56, %v748_v55 }
 0x1e7   :  { %v108_v10 = vpop.xlane.xlu1 %107 }
 0x1e8   :  { %v109_v60 = vcvt.f32.s32 %v108_v10 }
 0x1ea   :  { %v112_v14 = vadd.s32 %v111_v63, %v109_v60 }
 0x1ec   :  { %vm113_vm4 = vcmp.eq.s32.totalorder %v1630_v37, %v112_v14 }
 0x1ed   :  { %v964_v33 = vsel %vm113_vm4, 1.0, %v1348_v48 }
 0x1ee   :  { %v486_v38 = vcombine.high %v964_v33, %v964_v33  ;;  %v493_v44 = vrot.slane %v964_v33, %v1438_v15  ;;  %v755_v41 = vmul.f32 %v964_v33, %v754_v8  ;;  %v823_v18 = vmul.f32 %v964_v33, %v1423_v4 }
 0x1f0   :  { %v500_v47 = vrot.slane %v486_v38, %v1438_v15  ;;  %v501_v49 = vcombine.high %v493_v44, %v493_v44  ;;  %v509_v37 = vrot.slane %v493_v44, %v1438_v15  ;;  %1048 = vmatmul.mubr.f32.vlgmr.msra.gmra.mxu0 %v823_v18  ;;  %v757_v48 = vrot.slane %v755_v41, 1 }
 0x1f1   :  { %v758_v29 = vrot.slane %v755_v41, 2  ;;  %v759_v50 = vrot.slane %v755_v41, 3  ;;  %v760_v0 = vrot.slane %v755_v41, 4  ;;  %v761_v34 = vrot.slane %v755_v41, 5 }
 0x1f2   :  { %v502_v13 = vcombine.high %v500_v47, %v500_v47  ;;  %v516_v39 = vrot.slane %v500_v47, %v1438_v15  ;;  %v523_v4 = vrot.slane %v501_v49, %v1438_v15  ;;  %v531_v58 = vcombine.high %v509_v37, %v509_v37 }
 0x1f3   :  { %v546_v22 = vrot.slane %v509_v37, %v1420_v2  ;;  %v762_v7 = vrot.slane %v755_v41, 6  ;;  %v763_v61 = vrot.slane %v755_v41, 7  ;;  %v772_v30 = vadd.f32 %v755_v41, %v687_v3 }
 0x1f4   :  { %v530_v6 = vrot.slane %v502_v13, %v1438_v15  ;;  %v532_v20 = vcombine.high %v516_v39, %v516_v39  ;;  %v533_v42 = vcombine.high %v523_v4, %v523_v4  ;;  %v550_v51 = vrot.slane %v523_v4, %v1420_v2 }
 0x1f5   :  { %v554_v26 = vrot.slane %v531_v58, %v1420_v2  ;;  %v562_v10 = vrot.slane %v516_v39, %v1420_v2  ;;  %v583_v31 = vsel %vm481_vm3, %v1662_v52, %v546_v22  ;;  %v773_v36 = vadd.f32 %v757_v48, %v696_v43 }
 0x1f6   :  { %v534_v40 = vcombine.high %v530_v6, %v530_v6  ;;  %v558_v55 = vrot.slane %v533_v42, %v1420_v2  ;;  %v566_v59 = vrot.slane %v530_v6, %v1420_v2  ;;  %v570_v15 = vrot.slane %v532_v20, %v1420_v2  ;;  %615 = vst [vmem:[#allocation11] sm:$0xff] %v583_v31 }
 0x1f7   :  { %v587_v63 = vsel %vm481_vm3, %v1664_v53, %v550_v51  ;;  %v591_v60 = vsel %vm481_vm3, %v1666_v54, %v554_v26  ;;  %v599_v52 = vsel %vm481_vm3, %v1670_v21, %v562_v10  ;;  %v774_v11 = vadd.f32 %v758_v29, %v705_v32 }
 0x1f8   :  { %v574_v9 = vrot.slane %v534_v40, %v1420_v2  ;;  %v595_v24 = vsel %vm481_vm3, %v1668_v57, %v558_v55  ;;  %v603_v16 = vsel %vm481_vm3, %v1672_v28, %v566_v59  ;;  %v607_v53 = vsel %vm481_vm3, %v1674_v62, %v570_v15  ;;  %619 = vst [vmem:[#allocation11 + $0x20] sm:$0xff] %v587_v63 }
 0x1f9   :  { %623 = vst [vmem:[#allocation11 + $0x40] sm:$0xff] %v591_v60  ;;  %631 = vst [vmem:[#allocation11 + $0x80] sm:$0xff] %v599_v52  ;;  %v775_v54 = vadd.f32 %v759_v50, %v714_v12  ;;  %v776_v2 = vadd.f32 %v760_v0, %v723_v45  ;;  %v777_v21 = vadd.f32 %v761_v34, %v732_v46 }
 0x1fa   :  { %627 = vst [vmem:[#allocation11 + $0x60] sm:$0xff] %v595_v24  ;;  %635 = vst [vmem:[#allocation11 + $0xa0] sm:$0xff] %v603_v16  ;;  %v778_v8 = vadd.f32 %v762_v7, %v741_v5  ;;  %v611_v57 = vsel %vm481_vm3, %v1676_v35, %v574_v9  ;;  %v779_v14 = vadd.f32 %v763_v61, %v750_v27 }
 0x1fb   :  { %639 = vst [vmem:[#allocation11 + $0xc0] sm:$0xff] %v607_v53  ;;  %v785_v28 = vadd.f32 %v1715_v23, %v773_v36  ;;  %643 = vst [vmem:[#allocation11 + $0xe0] sm:$0xff] %v611_v57  ;;  %v786_v62 = vadd.f32 %v1715_v23, %v774_v11  ;;  %v787_v17 = vadd.f32 %v1715_v23, %v775_v54 }
 0x1fc   :  { %v788_v25 = vadd.f32 %v1715_v23, %v776_v2  ;;  %v784_v19 = vadd.f32 %v1715_v23, %v772_v30  ;;  %v789_v56 = vadd.f32 %v1715_v23, %v777_v21  ;;  %v790_v1 = vadd.f32 %v1715_v23, %v778_v8 }
 0x1fd   :  { %v800_v3 = vrot.slane %v785_v28, 7  ;;  %v803_v35 = vrot.slane %v786_v62, 6  ;;  %v791_v33 = vadd.f32 %v1715_v23, %v779_v14  ;;  %v806_v32 = vrot.slane %v787_v17, 5 }
 0x1fe   :  { %v809_v38 = vrot.slane %v788_v25, 4  ;;  %v812_v41 = vrot.slane %v789_v56, 3  ;;  %v815_v45 = vrot.slane %v790_v1, 2 }
 0x1ff   :  { %v802_v43 = vsel %vm801_vm5, %v800_v3, %v784_v19  ;;  %v818_v5 = vrot.slane %v791_v33, 1 }
 0x200   :  { %v805_v12 = vsel %vm804_vm6, %v803_v35, %v802_v43 }
 0x201   :  { %v808_v44 = vsel %vm807_vm7, %v806_v32, %v805_v12 }
 0x202   :  { %v811_v18 = vsel %vm810_vm8, %v809_v38, %v808_v44 }
 0x203   :  { %v814_v46 = vsel %vm813_vm9, %v812_v41, %v811_v18 }
 0x204   :  { %v817_v27 = vsel %vm816_vm10, %v815_v45, %v814_v46 }
 0x205   :  { %v820_v47 = vsel %vm819_vm11, %v818_v5, %v817_v27 }
 0x206   :  { %822 = vst [vmem:[#allocation10] sm:$0xff] %v820_v47 }
 0x207   :  { %1282 = shalt.err (!%p1279_p10)
}
 0x208   :  { %939 = dma.vmem_to_hbm [thread:$0]  %s934_s4, 4096, %s1789_s7, [#allocation12], %s1344_s1, %s1344_s1, %s1345_s18  }
 0x209   :  { %s1351_s29 = smov [#allocation10]  }
 0x20a   :  { %s924_s30 = sshll.u32 %s1351_s29, 4  ;;  %s925_s30 = int_to_ptr.vmem [resolvable:$true] %s924_s30 }
 0x20b   :  { %s1291_s9 = scalar_lea.vmem %s925_s30, 128  ;;  %p1296_p12 = scmp.lt.s32.totalorder %s925_s30, %s925_s30 }
 0x20c   :  { %p1292_p11 = scmp.ne.s32.totalorder %s925_s30, %s1291_s9  ;;  %p1297_p13 = scmp.lt.s32.totalorder %s1291_s9, %s1291_s9 }
 0x20e   :  { %p1298_p0 = por %p1297_p13, %p1296_p12 }
 0x210   :  { %p1299_p1 = pnand %p1298_p0, %p1292_p11 }
 0x212   :  { %1302 = shalt.err (!%p1299_p1)
}
 0x213   :  { %927 = dma.vmem_to_hbm [thread:$0]  %s925_s30, 128, %s1788_s6, [#allocation4]   ;;  %v997_v23 = vld [vmem:[%s1787_s5] ss:$0 sm:$0xff] }
 0x214   :  { %s1352_s14 = smov [#allocation13]  }
 0x215   :  { %s946_s7 = sshll.u32 %s1352_s14, 4  ;;  %s947_s7 = int_to_ptr.vmem [resolvable:$true] %s946_s7 }
 0x216   :  { %s1311_s15 = scalar_lea.vmem %s947_s7, 128  ;;  %p1316_p3 = scmp.lt.s32.totalorder %s947_s7, %s947_s7 }
 0x217   :  { %p1312_p2 = scmp.ne.s32.totalorder %s947_s7, %s1311_s15  ;;  %p1317_p4 = scmp.lt.s32.totalorder %s1311_s15, %s1311_s15 }
 0x219   :  { %p1318_p5 = por %p1317_p4, %p1316_p3 }
 0x21b   :  { %p1319_p6 = pnand %p1318_p5, %p1312_p2 }
 0x2b0   :  { %v913_v49 = vpop.f32.mrf.mxu0 }
 0x2b1   :  { %v914_v37 = vadd.f32 %v997_v23, %v913_v49 }
 0x2b2   :  { %v1049_v48 = vpop.f32.mrf.mxu0 }
 0x2b3   :  { %917 = vst [vmem:[#allocation13] sm:$0xff] %v914_v37 }
 0x2b4   :  { %1322 = shalt.err (!%p1319_p6)
}
 0x2b5   :  { %949 = dma.vmem_to_hbm [thread:$0]  %s947_s7, 128, %s1790_s8, [#allocation12]  }
 0x2b6   :  { %1337 = dma.done.wait [#allocation4], 128  }
 0x2b7   :  { %1338 = vsyncadd [#allocation4], 4294967168 }
 0x2b8   :  { %1339 = dma.done.wait [#allocation12], 4224  }
 0x2b9   :  { %1340 = vsyncadd [#allocation12], 4294963072 }
 0x2ba   :  { %959 = vsyncpa [#allocation3], 1 }
 0x2bb   :  { %960 = vsyncpa [#allocation6], 1 }
 0x2bc   :  { %961 = vsyncpa [#allocation9], 1 }
 0x2bd   :  { %962 = vsyncpa [#allocation4], 1 }
 0x2be   :  { %963 = vsyncpa [#allocation12], 1 }

</bundles_post_ra>
